<compile_context>
chip_gen: v7x
topology: tpu7x:2x2x1
jax: 0.10.0
libtpu: 0.0.40
codegen_flags: <defaults>
</compile_context>

<pallas_src>
import functools

import jax
import jax.numpy as jnp
from jax.experimental import pallas as pl
from jax.experimental.pallas import tpu as pltpu


def _dilated_block_kernel(*refs, layer_dims, dilations, NB, L, maxpad):
    # refs = (x_ref, mask_ref, w_0, b_0, ..., w_{n-1}, b_{n-1}, o_ref, buf_a, buf_b)
    #   x_ref   : (1, Cin, NB*L)        batch-folded raw (unpadded) input slab
    #   mask_ref: (1, W)                1.0 on valid columns, 0.0 on pad columns
    #   w_l     : (K, Cout_l, Cin_l)    per-tap slice w_ref[k] is a free view
    #   b_l     : (Cout_l, 1)
    #   o_ref   : (1, Cout, W)          lane-dense output slab (W = NB*Lp)
    #   buf_*   : (Cmax, W + 2*maxpad)  f32 ping-pong activation slabs in VMEM
    n_layers = len(dilations)
    x_ref, mask_ref = refs[0], refs[1]
    wb_refs = refs[2:2 + 2 * n_layers]
    o_ref = refs[2 + 2 * n_layers]
    buf_a, buf_b = refs[-2], refs[-1]

    Lp = L + 2 * maxpad
    W = NB * Lp
    mask = mask_ref[...]                                    # (1, W)

    # Zero both slabs: this IS the "same" zero padding (inter-batch pad columns
    # and outer margins must read as exact zeros for every dilated tap).
    buf_a[...] = jnp.zeros_like(buf_a)
    buf_b[...] = jnp.zeros_like(buf_b)

    # Scatter the raw input into the valid columns of each per-batch sub-slab.
    cin0 = layer_dims[0][0]
    for b in range(NB):                                     # static unroll
        dst = maxpad + b * Lp + maxpad
        buf_a[0:cin0, dst:dst + L] = (
            x_ref[0, :, b * L:(b + 1) * L].astype(jnp.float32))

    bufs = (buf_a, buf_b)
    cur = 0
    for li, d in enumerate(dilations):                      # static layer unroll
        cin, cout = layer_dims[li]
        w_ref = wb_refs[2 * li]                             # (K, Cout, Cin)
        b_ref = wb_refs[2 * li + 1]                         # (Cout, 1)
        K = w_ref.shape[0]
        src = bufs[cur]

        # Bias hoisted into the accumulator init (saves a VPU add per vreg).
        acc = jnp.broadcast_to(b_ref[...], (cout, W)).astype(jnp.float32)
        for k in range(K):                                  # static tap unroll
            off = maxpad + (k - 1) * d                      # static, in [0, 2*maxpad]
            xk = src[0:cin, off:off + W]                    # (Cin, W) static slice
            acc = acc + jnp.dot(w_ref[k], xk,
                                preferred_element_type=jnp.float32)

        # Zero the pad columns so the next layer sees proper zero padding
        # (cross-slab leakage only ever lands in these masked columns).
        val = acc * mask
        if li == n_layers - 1:
            o_ref[0] = val.astype(o_ref.dtype)              # one lane-dense store
        else:
            bufs[1 - cur][0:cout, maxpad:maxpad + W] = val
            cur = 1 - cur


def _num_batch_groups(N, Lp, Cmax, maxpad, budget_bytes=8 << 20):
    """Pick the number of batch groups (grid steps).

    Smallest divisor of N (>= 2 when possible, so v7x's two TensorCores both
    get work) whose two f32 ping-pong VMEM slabs fit an ~8 MiB budget --
    comfortably inside the 32 MiB scoped-VMEM default on v5e/v6e/v7x.
    """
    def slab_bytes(g):
        return 2 * Cmax * ((N // g) * Lp + 2 * maxpad) * 4

    divisors = [g for g in range(1, N + 1) if N % g == 0]
    fitting = [g for g in divisors if slab_bytes(g) <= budget_bytes]
    if not fitting:
        return divisors[-1]                                 # NB = 1 fallback
    multi = [g for g in fitting if g >= 2]
    return multi[0] if multi else fitting[0]


def dilated_conv_block_forward(params, x):
    """Fused DilatedConvBlock forward.  x: (N, C_in, L) -> (N, C_out, L)."""
    N, Cin, L = x.shape
    dilations = tuple(int(p["dilation"]) for p in params)
    K = params[0]["w"].shape[2]
    assert K == 3, "padding == dilation is length-preserving only for kernel_size=3"

    maxpad = max(dilations)
    Lp = L + 2 * maxpad

    layer_dims, c = [], Cin
    for p in params:
        layer_dims.append((c, p["w"].shape[0]))
        c = p["w"].shape[0]
    Cout = layer_dims[-1][1]
    Cmax = max([Cin] + [co for _, co in layer_dims])

    G = _num_batch_groups(N, Lp, Cmax, maxpad)
    NB = N // G
    W = NB * Lp
    Wtot = W + 2 * maxpad        # outer margins keep every tap slice in-bounds

    # One-time layout glue: fold NB batch elements into the lane axis.
    xg = x.reshape(G, NB, Cin, L).transpose(0, 2, 1, 3).reshape(G, Cin, NB * L)

    # Validity mask over the batch-folded slab (1.0 valid / 0.0 pad columns).
    pos = jnp.arange(W) % Lp
    mask = ((pos >= maxpad) & (pos < maxpad + L)).astype(jnp.float32).reshape(1, W)

    # Pre-transpose weights to (K, Cout, Cin); bias as a (Cout, 1) column.
    ws = [jnp.transpose(p["w"], (2, 0, 1)) for p in params]
    bs = [p["b"].reshape(-1, 1) for p in params]

    kernel = functools.partial(
        _dilated_block_kernel, layer_dims=tuple(layer_dims),
        dilations=dilations, NB=NB, L=L, maxpad=maxpad)

    in_specs = [pl.BlockSpec((1, Cin, NB * L), lambda g: (g, 0, 0)),
                pl.BlockSpec((1, W), lambda g: (0, 0))]
    inputs = [xg, mask]
    for w, b in zip(ws, bs):
        in_specs.append(pl.BlockSpec(w.shape, lambda g: (0, 0, 0)))
        in_specs.append(pl.BlockSpec(b.shape, lambda g: (0, 0)))
        inputs.extend([w, b])

    out = pl.pallas_call(
        kernel,
        out_shape=jax.ShapeDtypeStruct((G, Cout, W), x.dtype),
        grid=(G,),
        in_specs=in_specs,
        out_specs=pl.BlockSpec((1, Cout, W), lambda g: (g, 0, 0)),
        scratch_shapes=[pltpu.VMEM((Cmax, Wtot), jnp.float32),
                        pltpu.VMEM((Cmax, Wtot), jnp.float32)],
        compiler_params=pltpu.CompilerParams(
            dimension_semantics=("parallel",)),
    )(*inputs)

    # Un-fold once at the end: drop pad columns, restore (N, C_out, L).
    y = out.reshape(G, Cout, NB, Lp)[:, :, :, maxpad:maxpad + L]
    y = y.transpose(0, 2, 1, 3).reshape(N, Cout, L)
    # TODO(synk): nn.Dropout is identity at inference; training-mode dropout
    # (pltpu.prng_random_bits mask + 1/(1-p) scaling) not implemented here.
    return y


def init_dilated_conv_block_params(key, in_channels, out_channels, kernel_size,
                                    num_block_layer):
    """Deterministic parameter init mirroring the module's layer list."""
    dilations = [1] + [2 ** (l + 1) for l in range(num_block_layer - 2)] + [1]
    params = []
    c_in = in_channels
    for d in dilations:
        key, kw, kb = jax.random.split(key, 3)
        scale = 1.0 / jnp.sqrt(c_in * kernel_size)
        w = jax.random.uniform(kw, (out_channels, c_in, kernel_size),
                               jnp.float32, -scale, scale)
        b = jax.random.uniform(kb, (out_channels,), jnp.float32, -scale, scale)
        params.append({"w": w, "b": b, "dilation": d})
        c_in = out_channels
    return params


def _reference_forward(params, x):
    out = x
    for p in params:
        d = p["dilation"]
        out = jax.lax.conv_general_dilated(
            out, p["w"],
            window_strides=(1,),
            padding=[(d, d)],
            rhs_dilation=(d,),
            dimension_numbers=("NCH", "OIH", "NCH"),
        ) + p["b"][None, :, None]
    return out


if __name__ == "__main__":
    # Small shapes consistent with the module: batch=2, in_channels=4,
    # out_channels=8, kernel_size=3, num_block_layer=4, seq length=16.
    key = jax.random.PRNGKey(0)
    key, kx = jax.random.split(key)
    N, C_IN, C_OUT, K, LAYERS, L = 2, 4, 8, 3, 4, 16

    x = jax.random.normal(kx, (N, C_IN, L), jnp.float32)
    params = init_dilated_conv_block_params(key, C_IN, C_OUT, K, LAYERS)

    out = jax.block_until_ready(dilated_conv_block_forward(params, x))

    ref = _reference_forward(params, x)
    assert out.shape == (N, C_OUT, L)
    assert jnp.allclose(out, ref, atol=1e-4, rtol=1e-4), (
        float(jnp.max(jnp.abs(out - ref))))

    print("KERNEL_OK")
</pallas_src>

<mosaic_0001>
module attributes {stable_mosaic.version = 11 : i64} {
  func.func @_dilated_block_kernel(%arg0: i32, %arg1: memref<1x4x16xf32, #tpu.memory_space<vmem>>, %arg2: memref<1x24xf32, #tpu.memory_space<vmem>>, %arg3: memref<3x8x4xf32, #tpu.memory_space<vmem>>, %arg4: memref<8x1xf32, #tpu.memory_space<vmem>>, %arg5: memref<3x8x8xf32, #tpu.memory_space<vmem>>, %arg6: memref<8x1xf32, #tpu.memory_space<vmem>>, %arg7: memref<3x8x8xf32, #tpu.memory_space<vmem>>, %arg8: memref<8x1xf32, #tpu.memory_space<vmem>>, %arg9: memref<3x8x8xf32, #tpu.memory_space<vmem>>, %arg10: memref<8x1xf32, #tpu.memory_space<vmem>>, %arg11: memref<1x8x24xf32, #tpu.memory_space<vmem>>, %arg12: memref<8x32xf32, #tpu.memory_space<vmem>>, %arg13: memref<8x32xf32, #tpu.memory_space<vmem>>) attributes {dimension_semantics = [#tpu.dimension_semantics<parallel>], iteration_bounds = array<i64: 2>, scalar_prefetch = 0 : i64, scratch_operands = 2 : i64, tpu.core_type = #tpu.core_type<tc>, window_params = [{transform_indices = @transform_0, window_bounds = array<i64: 1, 4, 16>}, {pipeline_mode = #tpu.pipeline_mode<synchronous>, transform_indices = @transform_1, window_bounds = array<i64: 1, 24>}, {pipeline_mode = #tpu.pipeline_mode<synchronous>, transform_indices = @transform_2, window_bounds = array<i64: 3, 8, 4>}, {pipeline_mode = #tpu.pipeline_mode<synchronous>, transform_indices = @transform_3, window_bounds = array<i64: 8, 1>}, {pipeline_mode = #tpu.pipeline_mode<synchronous>, transform_indices = @transform_4, window_bounds = array<i64: 3, 8, 8>}, {pipeline_mode = #tpu.pipeline_mode<synchronous>, transform_indices = @transform_5, window_bounds = array<i64: 8, 1>}, {pipeline_mode = #tpu.pipeline_mode<synchronous>, transform_indices = @transform_6, window_bounds = array<i64: 3, 8, 8>}, {pipeline_mode = #tpu.pipeline_mode<synchronous>, transform_indices = @transform_7, window_bounds = array<i64: 8, 1>}, {pipeline_mode = #tpu.pipeline_mode<synchronous>, transform_indices = @transform_8, window_bounds = array<i64: 3, 8, 8>}, {pipeline_mode = #tpu.pipeline_mode<synchronous>, transform_indices = @transform_9, window_bounds = array<i64: 8, 1>}, {transform_indices = @transform_10, window_bounds = array<i64: 1, 8, 24>}]} {
    %c0 = arith.constant 0 : index
    %c0_0 = arith.constant 0 : index
    %0 = vector.load %arg2[%c0, %c0_0] : memref<1x24xf32, #tpu.memory_space<vmem>>, vector<1x24xf32>
    %cst = arith.constant 0.000000e+00 : f32
    %1 = vector.broadcast %cst : f32 to vector<8x32xf32>
    %c0_1 = arith.constant 0 : index
    %c0_2 = arith.constant 0 : index
    %2 = vector.load %arg12[%c0_1, %c0_2] : memref<8x32xf32, #tpu.memory_space<vmem>>, vector<8x32xf32>
    tpu.vector_store %arg12[%c0_1, %c0_2], %1 {strides = array<i32>} : memref<8x32xf32, #tpu.memory_space<vmem>>, vector<8x32xf32>,
    %cst_3 = arith.constant 0.000000e+00 : f32
    %3 = vector.broadcast %cst_3 : f32 to vector<8x32xf32>
    %c0_4 = arith.constant 0 : index
    %c0_5 = arith.constant 0 : index
    %4 = vector.load %arg13[%c0_4, %c0_5] : memref<8x32xf32, #tpu.memory_space<vmem>>, vector<8x32xf32>
    tpu.vector_store %arg13[%c0_4, %c0_5], %3 {strides = array<i32>} : memref<8x32xf32, #tpu.memory_space<vmem>>, vector<8x32xf32>,
    %c0_6 = arith.constant 0 : index
    %c0_7 = arith.constant 0 : index
    %c0_8 = arith.constant 0 : index
    %5 = vector.load %arg1[%c0_6, %c0_7, %c0_8] : memref<1x4x16xf32, #tpu.memory_space<vmem>>, vector<1x4x16xf32>
    %6 = vector.shape_cast %5 : vector<1x4x16xf32> to vector<4x16xf32>
    %c0_9 = arith.constant 0 : index
    %c8 = arith.constant 8 : index
    %7 = vector.load %arg12[%c0_9, %c8] : memref<8x32xf32, #tpu.memory_space<vmem>>, vector<4x16xf32>
    tpu.vector_store %arg12[%c0_9, %c8], %6 {strides = array<i32>} : memref<8x32xf32, #tpu.memory_space<vmem>>, vector<4x16xf32>,
    %c0_10 = arith.constant 0 : index
    %c0_11 = arith.constant 0 : index
    %8 = vector.load %arg4[%c0_10, %c0_11] : memref<8x1xf32, #tpu.memory_space<vmem>>, vector<8x1xf32>
    %9 = vector.shape_cast %8 : vector<8x1xf32> to vector<8x1xf32>
    %10 = vector.broadcast %9 : vector<8x1xf32> to vector<8x24xf32>
    %c0_12 = arith.constant 0 : index
    %c3 = arith.constant 3 : index
    %11 = vector.load %arg12[%c0_12, %c3] : memref<8x32xf32, #tpu.memory_space<vmem>>, vector<4x24xf32>
    %c0_13 = arith.constant 0 : index
    %c0_14 = arith.constant 0 : index
    %c0_15 = arith.constant 0 : index
    %12 = vector.load %arg3[%c0_13, %c0_14, %c0_15] : memref<3x8x4xf32, #tpu.memory_space<vmem>>, vector<1x8x4xf32>
    %13 = vector.shape_cast %12 : vector<1x8x4xf32> to vector<8x4xf32>
    %cst_16 = arith.constant dense<0.000000e+00> : vector<8x24xf32>
    %14 = tpu.matmul %13, %11, %cst_16 {dimension_numbers = #tpu.dot_dimension_numbers<[1], [0], [0], [1], [0, 0, 1, 1], [], []>} : vector<8x4xf32>, vector<4x24xf32>, vector<8x24xf32> -> vector<8x24xf32>
    %15 = arith.addf %10, %14 : vector<8x24xf32>
    %c0_17 = arith.constant 0 : index
    %c4 = arith.constant 4 : index
    %16 = vector.load %arg12[%c0_17, %c4] : memref<8x32xf32, #tpu.memory_space<vmem>>, vector<4x24xf32>
    %c1 = arith.constant 1 : index
    %c0_18 = arith.constant 0 : index
    %c0_19 = arith.constant 0 : index
    %17 = vector.load %arg3[%c1, %c0_18, %c0_19] : memref<3x8x4xf32, #tpu.memory_space<vmem>>, vector<1x8x4xf32>
    %18 = vector.shape_cast %17 : vector<1x8x4xf32> to vector<8x4xf32>
    %cst_20 = arith.constant dense<0.000000e+00> : vector<8x24xf32>
    %19 = tpu.matmul %18, %16, %cst_20 {dimension_numbers = #tpu.dot_dimension_numbers<[1], [0], [0], [1], [0, 0, 1, 1], [], []>} : vector<8x4xf32>, vector<4x24xf32>, vector<8x24xf32> -> vector<8x24xf32>
    %20 = arith.addf %15, %19 : vector<8x24xf32>
    %c0_21 = arith.constant 0 : index
    %c5 = arith.constant 5 : index
    %21 = vector.load %arg12[%c0_21, %c5] : memref<8x32xf32, #tpu.memory_space<vmem>>, vector<4x24xf32>
    %c2 = arith.constant 2 : index
    %c0_22 = arith.constant 0 : index
    %c0_23 = arith.constant 0 : index
    %22 = vector.load %arg3[%c2, %c0_22, %c0_23] : memref<3x8x4xf32, #tpu.memory_space<vmem>>, vector<1x8x4xf32>
    %23 = vector.shape_cast %22 : vector<1x8x4xf32> to vector<8x4xf32>
    %cst_24 = arith.constant dense<0.000000e+00> : vector<8x24xf32>
    %24 = tpu.matmul %23, %21, %cst_24 {dimension_numbers = #tpu.dot_dimension_numbers<[1], [0], [0], [1], [0, 0, 1, 1], [], []>} : vector<8x4xf32>, vector<4x24xf32>, vector<8x24xf32> -> vector<8x24xf32>
    %25 = arith.addf %20, %24 : vector<8x24xf32>
    %26 = vector.broadcast %0 : vector<1x24xf32> to vector<8x24xf32>
    %27 = arith.mulf %25, %26 : vector<8x24xf32>
    %c0_25 = arith.constant 0 : index
    %c4_26 = arith.constant 4 : index
    %28 = vector.load %arg13[%c0_25, %c4_26] : memref<8x32xf32, #tpu.memory_space<vmem>>, vector<8x24xf32>
    tpu.vector_store %arg13[%c0_25, %c4_26], %27 {strides = array<i32>} : memref<8x32xf32, #tpu.memory_space<vmem>>, vector<8x24xf32>,
    %c0_27 = arith.constant 0 : index
    %c0_28 = arith.constant 0 : index
    %29 = vector.load %arg6[%c0_27, %c0_28] : memref<8x1xf32, #tpu.memory_space<vmem>>, vector<8x1xf32>
    %30 = vector.shape_cast %29 : vector<8x1xf32> to vector<8x1xf32>
    %31 = vector.broadcast %30 : vector<8x1xf32> to vector<8x24xf32>
    %c0_29 = arith.constant 0 : index
    %c2_30 = arith.constant 2 : index
    %32 = vector.load %arg13[%c0_29, %c2_30] : memref<8x32xf32, #tpu.memory_space<vmem>>, vector<8x24xf32>
    %c0_31 = arith.constant 0 : index
    %c0_32 = arith.constant 0 : index
    %c0_33 = arith.constant 0 : index
    %33 = vector.load %arg5[%c0_31, %c0_32, %c0_33] : memref<3x8x8xf32, #tpu.memory_space<vmem>>, vector<1x8x8xf32>
    %34 = vector.shape_cast %33 : vector<1x8x8xf32> to vector<8x8xf32>
    %cst_34 = arith.constant dense<0.000000e+00> : vector<8x24xf32>
    %35 = tpu.matmul %34, %32, %cst_34 {dimension_numbers = #tpu.dot_dimension_numbers<[1], [0], [0], [1], [0, 0, 1, 1], [], []>} : vector<8x8xf32>, vector<8x24xf32>, vector<8x24xf32> -> vector<8x24xf32>
    %36 = arith.addf %31, %35 : vector<8x24xf32>
    %c0_35 = arith.constant 0 : index
    %c4_36 = arith.constant 4 : index
    %37 = vector.load %arg13[%c0_35, %c4_36] : memref<8x32xf32, #tpu.memory_space<vmem>>, vector<8x24xf32>
    %c1_37 = arith.constant 1 : index
    %c0_38 = arith.constant 0 : index
    %c0_39 = arith.constant 0 : index
    %38 = vector.load %arg5[%c1_37, %c0_38, %c0_39] : memref<3x8x8xf32, #tpu.memory_space<vmem>>, vector<1x8x8xf32>
    %39 = vector.shape_cast %38 : vector<1x8x8xf32> to vector<8x8xf32>
    %cst_40 = arith.constant dense<0.000000e+00> : vector<8x24xf32>
    %40 = tpu.matmul %39, %37, %cst_40 {dimension_numbers = #tpu.dot_dimension_numbers<[1], [0], [0], [1], [0, 0, 1, 1], [], []>} : vector<8x8xf32>, vector<8x24xf32>, vector<8x24xf32> -> vector<8x24xf32>
    %41 = arith.addf %36, %40 : vector<8x24xf32>
    %c0_41 = arith.constant 0 : index
    %c6 = arith.constant 6 : index
    %42 = vector.load %arg13[%c0_41, %c6] : memref<8x32xf32, #tpu.memory_space<vmem>>, vector<8x24xf32>
    %c2_42 = arith.constant 2 : index
    %c0_43 = arith.constant 0 : index
    %c0_44 = arith.constant 0 : index
    %43 = vector.load %arg5[%c2_42, %c0_43, %c0_44] : memref<3x8x8xf32, #tpu.memory_space<vmem>>, vector<1x8x8xf32>
    %44 = vector.shape_cast %43 : vector<1x8x8xf32> to vector<8x8xf32>
    %cst_45 = arith.constant dense<0.000000e+00> : vector<8x24xf32>
    %45 = tpu.matmul %44, %42, %cst_45 {dimension_numbers = #tpu.dot_dimension_numbers<[1], [0], [0], [1], [0, 0, 1, 1], [], []>} : vector<8x8xf32>, vector<8x24xf32>, vector<8x24xf32> -> vector<8x24xf32>
    %46 = arith.addf %41, %45 : vector<8x24xf32>
    %47 = vector.broadcast %0 : vector<1x24xf32> to vector<8x24xf32>
    %48 = arith.mulf %46, %47 : vector<8x24xf32>
    %c0_46 = arith.constant 0 : index
    %c4_47 = arith.constant 4 : index
    %49 = vector.load %arg12[%c0_46, %c4_47] : memref<8x32xf32, #tpu.memory_space<vmem>>, vector<8x24xf32>
    tpu.vector_store %arg12[%c0_46, %c4_47], %48 {strides = array<i32>} : memref<8x32xf32, #tpu.memory_space<vmem>>, vector<8x24xf32>,
    %c0_48 = arith.constant 0 : index
    %c0_49 = arith.constant 0 : index
    %50 = vector.load %arg8[%c0_48, %c0_49] : memref<8x1xf32, #tpu.memory_space<vmem>>, vector<8x1xf32>
    %51 = vector.shape_cast %50 : vector<8x1xf32> to vector<8x1xf32>
    %52 = vector.broadcast %51 : vector<8x1xf32> to vector<8x24xf32>
    %c0_50 = arith.constant 0 : index
    %c0_51 = arith.constant 0 : index
    %53 = vector.load %arg12[%c0_50, %c0_51] : memref<8x32xf32, #tpu.memory_space<vmem>>, vector<8x24xf32>
    %c0_52 = arith.constant 0 : index
    %c0_53 = arith.constant 0 : index
    %c0_54 = arith.constant 0 : index
    %54 = vector.load %arg7[%c0_52, %c0_53, %c0_54] : memref<3x8x8xf32, #tpu.memory_space<vmem>>, vector<1x8x8xf32>
    %55 = vector.shape_cast %54 : vector<1x8x8xf32> to vector<8x8xf32>
    %cst_55 = arith.constant dense<0.000000e+00> : vector<8x24xf32>
    %56 = tpu.matmul %55, %53, %cst_55 {dimension_numbers = #tpu.dot_dimension_numbers<[1], [0], [0], [1], [0, 0, 1, 1], [], []>} : vector<8x8xf32>, vector<8x24xf32>, vector<8x24xf32> -> vector<8x24xf32>
    %57 = arith.addf %52, %56 : vector<8x24xf32>
    %c0_56 = arith.constant 0 : index
    %c4_57 = arith.constant 4 : index
    %58 = vector.load %arg12[%c0_56, %c4_57] : memref<8x32xf32, #tpu.memory_space<vmem>>, vector<8x24xf32>
    %c1_58 = arith.constant 1 : index
    %c0_59 = arith.constant 0 : index
    %c0_60 = arith.constant 0 : index
    %59 = vector.load %arg7[%c1_58, %c0_59, %c0_60] : memref<3x8x8xf32, #tpu.memory_space<vmem>>, vector<1x8x8xf32>
    %60 = vector.shape_cast %59 : vector<1x8x8xf32> to vector<8x8xf32>
    %cst_61 = arith.constant dense<0.000000e+00> : vector<8x24xf32>
    %61 = tpu.matmul %60, %58, %cst_61 {dimension_numbers = #tpu.dot_dimension_numbers<[1], [0], [0], [1], [0, 0, 1, 1], [], []>} : vector<8x8xf32>, vector<8x24xf32>, vector<8x24xf32> -> vector<8x24xf32>
    %62 = arith.addf %57, %61 : vector<8x24xf32>
    %c0_62 = arith.constant 0 : index
    %c8_63 = arith.constant 8 : index
    %63 = vector.load %arg12[%c0_62, %c8_63] : memref<8x32xf32, #tpu.memory_space<vmem>>, vector<8x24xf32>
    %c2_64 = arith.constant 2 : index
    %c0_65 = arith.constant 0 : index
    %c0_66 = arith.constant 0 : index
    %64 = vector.load %arg7[%c2_64, %c0_65, %c0_66] : memref<3x8x8xf32, #tpu.memory_space<vmem>>, vector<1x8x8xf32>
    %65 = vector.shape_cast %64 : vector<1x8x8xf32> to vector<8x8xf32>
    %cst_67 = arith.constant dense<0.000000e+00> : vector<8x24xf32>
    %66 = tpu.matmul %65, %63, %cst_67 {dimension_numbers = #tpu.dot_dimension_numbers<[1], [0], [0], [1], [0, 0, 1, 1], [], []>} : vector<8x8xf32>, vector<8x24xf32>, vector<8x24xf32> -> vector<8x24xf32>
    %67 = arith.addf %62, %66 : vector<8x24xf32>
    %68 = vector.broadcast %0 : vector<1x24xf32> to vector<8x24xf32>
    %69 = arith.mulf %67, %68 : vector<8x24xf32>
    %c0_68 = arith.constant 0 : index
    %c4_69 = arith.constant 4 : index
    %70 = vector.load %arg13[%c0_68, %c4_69] : memref<8x32xf32, #tpu.memory_space<vmem>>, vector<8x24xf32>
    tpu.vector_store %arg13[%c0_68, %c4_69], %69 {strides = array<i32>} : memref<8x32xf32, #tpu.memory_space<vmem>>, vector<8x24xf32>,
    %c0_70 = arith.constant 0 : index
    %c0_71 = arith.constant 0 : index
    %71 = vector.load %arg10[%c0_70, %c0_71] : memref<8x1xf32, #tpu.memory_space<vmem>>, vector<8x1xf32>
    %72 = vector.shape_cast %71 : vector<8x1xf32> to vector<8x1xf32>
    %73 = vector.broadcast %72 : vector<8x1xf32> to vector<8x24xf32>
    %c0_72 = arith.constant 0 : index
    %c3_73 = arith.constant 3 : index
    %74 = vector.load %arg13[%c0_72, %c3_73] : memref<8x32xf32, #tpu.memory_space<vmem>>, vector<8x24xf32>
    %c0_74 = arith.constant 0 : index
    %c0_75 = arith.constant 0 : index
    %c0_76 = arith.constant 0 : index
    %75 = vector.load %arg9[%c0_74, %c0_75, %c0_76] : memref<3x8x8xf32, #tpu.memory_space<vmem>>, vector<1x8x8xf32>
    %76 = vector.shape_cast %75 : vector<1x8x8xf32> to vector<8x8xf32>
    %cst_77 = arith.constant dense<0.000000e+00> : vector<8x24xf32>
    %77 = tpu.matmul %76, %74, %cst_77 {dimension_numbers = #tpu.dot_dimension_numbers<[1], [0], [0], [1], [0, 0, 1, 1], [], []>} : vector<8x8xf32>, vector<8x24xf32>, vector<8x24xf32> -> vector<8x24xf32>
    %78 = arith.addf %73, %77 : vector<8x24xf32>
    %c0_78 = arith.constant 0 : index
    %c4_79 = arith.constant 4 : index
    %79 = vector.load %arg13[%c0_78, %c4_79] : memref<8x32xf32, #tpu.memory_space<vmem>>, vector<8x24xf32>
    %c1_80 = arith.constant 1 : index
    %c0_81 = arith.constant 0 : index
    %c0_82 = arith.constant 0 : index
    %80 = vector.load %arg9[%c1_80, %c0_81, %c0_82] : memref<3x8x8xf32, #tpu.memory_space<vmem>>, vector<1x8x8xf32>
    %81 = vector.shape_cast %80 : vector<1x8x8xf32> to vector<8x8xf32>
    %cst_83 = arith.constant dense<0.000000e+00> : vector<8x24xf32>
    %82 = tpu.matmul %81, %79, %cst_83 {dimension_numbers = #tpu.dot_dimension_numbers<[1], [0], [0], [1], [0, 0, 1, 1], [], []>} : vector<8x8xf32>, vector<8x24xf32>, vector<8x24xf32> -> vector<8x24xf32>
    %83 = arith.addf %78, %82 : vector<8x24xf32>
    %c0_84 = arith.constant 0 : index
    %c5_85 = arith.constant 5 : index
    %84 = vector.load %arg13[%c0_84, %c5_85] : memref<8x32xf32, #tpu.memory_space<vmem>>, vector<8x24xf32>
    %c2_86 = arith.constant 2 : index
    %c0_87 = arith.constant 0 : index
    %c0_88 = arith.constant 0 : index
    %85 = vector.load %arg9[%c2_86, %c0_87, %c0_88] : memref<3x8x8xf32, #tpu.memory_space<vmem>>, vector<1x8x8xf32>
    %86 = vector.shape_cast %85 : vector<1x8x8xf32> to vector<8x8xf32>
    %cst_89 = arith.constant dense<0.000000e+00> : vector<8x24xf32>
    %87 = tpu.matmul %86, %84, %cst_89 {dimension_numbers = #tpu.dot_dimension_numbers<[1], [0], [0], [1], [0, 0, 1, 1], [], []>} : vector<8x8xf32>, vector<8x24xf32>, vector<8x24xf32> -> vector<8x24xf32>
    %88 = arith.addf %83, %87 : vector<8x24xf32>
    %89 = vector.broadcast %0 : vector<1x24xf32> to vector<8x24xf32>
    %90 = arith.mulf %88, %89 : vector<8x24xf32>
    %c0_90 = arith.constant 0 : index
    %c0_91 = arith.constant 0 : index
    %c0_92 = arith.constant 0 : index
    %91 = vector.load %arg11[%c0_90, %c0_91, %c0_92] : memref<1x8x24xf32, #tpu.memory_space<vmem>>, vector<1x8x24xf32>
    %92 = vector.shape_cast %91 : vector<1x8x24xf32> to vector<8x24xf32>
    %93 = vector.shape_cast %90 : vector<8x24xf32> to vector<1x8x24xf32>
    tpu.vector_store %arg11[%c0_90, %c0_91, %c0_92], %93 {strides = array<i32>} : memref<1x8x24xf32, #tpu.memory_space<vmem>>, vector<1x8x24xf32>,
    return
  }
  func.func @transform_0(%arg0: i32) -> (i32, i32, i32) {
    %c0_i32 = arith.constant 0 : i32
    %c0_i32_0 = arith.constant 0 : i32
    %c0_i32_1 = arith.constant 0 : i32
    return %arg0, %c0_i32, %c0_i32_0 : i32, i32, i32
  }
  func.func @transform_1(%arg0: i32) -> (i32, i32) {
    %c0_i32 = arith.constant 0 : i32
    %c0_i32_0 = arith.constant 0 : i32
    %c0_i32_1 = arith.constant 0 : i32
    return %c0_i32, %c0_i32_0 : i32, i32
  }
  func.func @transform_2(%arg0: i32) -> (i32, i32, i32) {
    %c0_i32 = arith.constant 0 : i32
    %c0_i32_0 = arith.constant 0 : i32
    %c0_i32_1 = arith.constant 0 : i32
    %c0_i32_2 = arith.constant 0 : i32
    return %c0_i32, %c0_i32_0, %c0_i32_1 : i32, i32, i32
  }
  func.func @transform_3(%arg0: i32) -> (i32, i32) {
    %c0_i32 = arith.constant 0 : i32
    %c0_i32_0 = arith.constant 0 : i32
    %c0_i32_1 = arith.constant 0 : i32
    return %c0_i32, %c0_i32_0 : i32, i32
  }
  func.func @transform_4(%arg0: i32) -> (i32, i32, i32) {
    %c0_i32 = arith.constant 0 : i32
    %c0_i32_0 = arith.constant 0 : i32
    %c0_i32_1 = arith.constant 0 : i32
    %c0_i32_2 = arith.constant 0 : i32
    return %c0_i32, %c0_i32_0, %c0_i32_1 : i32, i32, i32
  }
  func.func @transform_5(%arg0: i32) -> (i32, i32) {
    %c0_i32 = arith.constant 0 : i32
    %c0_i32_0 = arith.constant 0 : i32
    %c0_i32_1 = arith.constant 0 : i32
    return %c0_i32, %c0_i32_0 : i32, i32
  }
  func.func @transform_6(%arg0: i32) -> (i32, i32, i32) {
    %c0_i32 = arith.constant 0 : i32
    %c0_i32_0 = arith.constant 0 : i32
    %c0_i32_1 = arith.constant 0 : i32
    %c0_i32_2 = arith.constant 0 : i32
    return %c0_i32, %c0_i32_0, %c0_i32_1 : i32, i32, i32
  }
  func.func @transform_7(%arg0: i32) -> (i32, i32) {
    %c0_i32 = arith.constant 0 : i32
    %c0_i32_0 = arith.constant 0 : i32
    %c0_i32_1 = arith.constant 0 : i32
    return %c0_i32, %c0_i32_0 : i32, i32
  }
  func.func @transform_8(%arg0: i32) -> (i32, i32, i32) {
    %c0_i32 = arith.constant 0 : i32
    %c0_i32_0 = arith.constant 0 : i32
    %c0_i32_1 = arith.constant 0 : i32
    %c0_i32_2 = arith.constant 0 : i32
    return %c0_i32, %c0_i32_0, %c0_i32_1 : i32, i32, i32
  }
  func.func @transform_9(%arg0: i32) -> (i32, i32) {
    %c0_i32 = arith.constant 0 : i32
    %c0_i32_0 = arith.constant 0 : i32
    %c0_i32_1 = arith.constant 0 : i32
    return %c0_i32, %c0_i32_0 : i32, i32
  }
  func.func @transform_10(%arg0: i32) -> (i32, i32, i32) {
    %c0_i32 = arith.constant 0 : i32
    %c0_i32_0 = arith.constant 0 : i32
    %c0_i32_1 = arith.constant 0 : i32
    return %arg0, %c0_i32, %c0_i32_0 : i32, i32, i32
  }
}

</mosaic_0001>

<bundles_post_ra>
// kernel: tpu_custom_call.1
= control target key start
LH: loop header
LB: loop body
LE: loop exit
PB: predicated region body
PF: predicated region fallthrough
CT: control target
= control target key end

     0   :  { %15 = vsyncpa [#allocation5], 0  ;;  %s2125_s0 = inlined_call_operand.hbm [shape: f32[2,4,16], index: 0, kind: input, shape index: {}]   ;;  %s2126_s1 = inlined_call_operand.vmem [shape: f32[1,24], index: 1, kind: input, shape index: {}]   ;;  %s2127_s2 = inlined_call_operand.vmem [shape: f32[3,8,4], index: 2, kind: input, shape index: {}]   ;;  %s2128_s3 = inlined_call_operand.vmem [shape: f32[8,1], index: 3, kind: input, shape index: {}]   ;;  %s2129_s4 = inlined_call_operand.vmem [shape: f32[3,8,8], index: 4, kind: input, shape index: {}]   ;;  %s2130_s5 = inlined_call_operand.vmem [shape: f32[8,1], index: 5, kind: input, shape index: {}]   ;;  %s2131_s6 = inlined_call_operand.vmem [shape: f32[3,8,8], index: 6, kind: input, shape index: {}]   ;;  %s2132_s7 = inlined_call_operand.vmem [shape: f32[8,1], index: 7, kind: input, shape index: {}]   ;;  %s2133_s8 = inlined_call_operand.vmem [shape: f32[3,8,8], index: 8, kind: input, shape index: {}]   ;;  %s2134_s9 = inlined_call_operand.vmem [shape: f32[8,1], index: 9, kind: input, shape index: {}]   ;;  %s2135_s10 = inlined_call_operand.hbm [shape: f32[2,8,24], index: 10, kind: output, shape index: {}]  }
   0x1   :  { %17 = vsyncpa [#allocation5 + $0x1], 0 }
   0x2   :  { %18 = vsyncpa [#allocation6], 0 }
   0x3   :  { %20 = vsyncpa [#allocation6 + $0x1], 0  ;;  %s1842_s13 = smov 0   ;;  %s1844_s14 = smov 0  }
   0x4   :  { %s1846_s15 = smov 0   ;;  %s1848_s16 = smov 0  }
   0x5 LB: > { %s1863_s17 = sadd.s32 4294967295, %s1772_s16   ;;  %s1477_s18 = sadd.s32 4294967294, %s1772_s16   ;;  %s1772_s16 = sphi %s1848_s16, %s2152_s16   ;;  %s1768_s15 = sphi %s1846_s15, %s2151_s15   ;;  %s1764_s14 = sphi %s1844_s14, %s2150_s14   ;;  %s1760_s13 = sphi %s1842_s13, %s2149_s13  }
   0x6   : > { %s1867_s19 = sadd.s32 1, %s1772_s16   ;;  %s33_s20 = sadd.s32 1, %s1768_s15 }
   0x7   : > { %s30_s21 = ssub.s32 %s1772_s16, %s1867_s19  ;;  %p40_p0 = scmp.ne.s32.totalorder %s1768_s15, %s1764_s14 }
   0x8   : > { %p31_p1 = scmp.eq.s32.totalorder %s30_s21, 0  ;;  %p41_p2 = scmp.eq.s32.totalorder %s1772_s16, 0 }
   0x9   : > { %p46_p3 = scmp.ne.s32.totalorder %s1764_s14, %s1760_s13  ;;  %p47_p4 = scmp.eq.s32.totalorder %s1863_s17, 0 }
   0xa   : > { %s1879_s22 = scalar_select %p31_p1, %s1768_s15, %s33_s20  }
   0xb   : > { %p1881_p5 = por %p41_p2, %p40_p0  ;;  %p1885_p6 = por %p47_p4, %p46_p3 }
   0xc   : > { %2137 = sst [smem:[#allocation10_spill]] %s1879_s22  ;;  %p259_p7 = scmp.eq.s32.totalorder %s1863_s17, 1 }
   0xd   : > { %p265_p8 = scmp.eq.s32.totalorder %s1477_s18, 1  ;;  %p1629_p10 = scmp.lt.s32.totalorder %s1772_s16, 2 }
   0xe   : > { %p1892_p11 = por %p259_p7, %p40_p0  ;;  %s312_s27 = sand.u32 1, %s1768_s15  }
   0xf   : > { %p1896_p12 = por %p265_p8, %p46_p3  ;;  %s1481_s28 = sshll.u32 %s1772_s16, 6 }
  0x10   : > { %s2140_s25 = scalar_select %p1892_p11, 1, 0 }
  0x11   : > { %s2141_s26 = scalar_select %p1896_p12, 1, 0 }
  0x12   : > { %s1480_s29 = sshll.u32 %s312_s27, 2  ;;  %s1905_s12 = scalar_lea.hbm %s2125_s0, %s1481_s28 }
  0x13   : > { %s316_s18 = scalar_lea.vmem [#allocation4], %s1480_s29  ;;  %p1909_p13 = pnand %p1629_p10, %p1881_p5 }
  0x14   : > { %s323_s20 = sshll.u32 %s316_s18, 4  ;;  %s313_s30 = scalar_lea.sflag [#allocation5], %s312_s27  ;;  %s1913_s20 = int_to_ptr.vmem [resolvable:$true] %s323_s20 }
  0x15   : > { %s1676_s28 = scalar_lea.hbm %s1905_s12, 64  ;;  %p1678_p3 = pneg %p1909_p13 }
  0x16   : > { %p1677_p2 = scmp.ne.s32.totalorder %s1905_s12, %s1676_s28  ;;  %s1681_s11 = scalar_lea.hbm %s2125_s0, 128 }
  0x17   : > { %p1682_p5 = scmp.lt.u32.totalorder %s1905_s12, %s2125_s0  ;;  %p1683_p8 = scmp.lt.u32.totalorder %s1681_s11, %s1676_s28 }
  0x18   : > { %p1679_p4 = pnand %p1678_p3, %p1677_p2  ;;  %p1685_p9 = scmp.lt.u32.totalorder %s1676_s28, %s1905_s12 }
  0x19   : > { %p1684_p10 = por %p1683_p8, %p1682_p5 }
  0x1a   : > { %p1680_p7 = pneg %p1679_p4 }
  0x1b   : > { %p1686_p0 = por %p1685_p9, %p1684_p10 }
  0x1d   : > { %p1687_p1 = pnand %p1686_p0, %p1680_p7 }
  0x1f   : > { %1690 = shalt.err (!%p1687_p1)
}
  0x20   : > { %s1691_s27 = scalar_lea.vmem %s1913_s20, 64  ;;  %s1774_s23 = smov [#allocation4]  }
  0x21   : > { %p1692_p2 = scmp.ne.s32.totalorder %s1913_s20, %s1691_s27  ;;  %s1696_s29 = sshll.u32 %s1774_s23, 4  ;;  %s1697_s29 = int_to_ptr.vmem [resolvable:$false] %s1696_s29 }
  0x22   : > { %s1698_s22 = scalar_lea.vmem %s1697_s29, 128  ;;  %p1699_p11 = scmp.lt.s32.totalorder %s1913_s20, %s1697_s29 }
  0x23   : > { %p1694_p4 = pnand %p1692_p2, %p1678_p3  ;;  %p1700_p5 = scmp.lt.s32.totalorder %s1698_s22, %s1691_s27 }
  0x25   : > { %p1695_p12 = pneg %p1694_p4  ;;  %p1701_p8 = por %p1700_p5, %p1699_p11 }
  0x27   : > { %p1702_p9 = pnand %p1701_p8, %p1695_p12 }
  0x29   : > { %1705 = shalt.err (!%p1702_p9)
}
  0x2a   : > { %1624 = dma.hbm_to_vmem [thread:$0]  (!%p1909_p13), %s1905_s12, 64, %s1913_s20, %s313_s30  }
  0x2b   : > { %p2143_p0 = scmp.lt.s32.totalorder %s1772_s16, 3  ;;  %p2144_p1 = scmp.ge.s32.totalorder %s1772_s16, 1 }
  0x2d   : > { %p329_p3 = pnand %p2144_p1, %p2143_p0 }
  0x2e   : > { %s1947_s28 = sand.u32 (!%p329_p3), 1, %s1764_s14  }
  0x2f   : > { %332 = sbr.rel (%p329_p3) target bundleno = 1947 (0x79b), region = 60  ;;  %s1483_s11 = sshll.u32 (!%p329_p3), %s1947_s28, 2 }
  0x30   : > { %s335_s18 = scalar_lea.sflag (!%p329_p3), [#allocation5], %s1947_s28  ;;  %s338_s27 = scalar_lea.vmem (!%p329_p3), [#allocation4], %s1483_s11 }
  0x36   : > { %1751 = dma.done.wait (%p1885_p6), %s335_s18, 64  }
  0x37   : > { %1753 = vsyncadd (%p1885_p6), %s335_s18, 4294967232  ;;  %vm376_vm0 = vcmask 261120   ;;  %v1775_v0 = vmov 0.0   ;;  %v379_v1 = vld [vmem:[%s338_s27] sm:$0xf]  ;;  %s1776_s12 = smov 8  }
  0x38   : > { %377 = vst.msk [vmem:[#allocation2] sm:$0xff] %vm376_vm0, %v1775_v0  ;;  %378 = vst.msk [vmem:[#allocation3] sm:$0xff] %vm376_vm0, %v1775_v0  ;;  %1537 = vmatprep.subr.mxu0 %v1775_v0  ;;  %1552 = vmatprep.subr.mxu1 %v1775_v0  ;;  %vm1777_vm1 = vmmov 0   ;;  %vm384_vm2 = vcmask 191552   ;;  %s1778_s24 = smov 124   ;;  %s1779_s20 = smov 125  }
  0x39   : > { %381 = vrot.lane.b32.xlu0 %v379_v1, %s1776_s12  ;;  %1539 = vmatprep.mubr.msk.f32.mxu0 %vm1777_vm1, %v1775_v0  ;;  %s1780_s21 = smov 123   ;;  %v386_v4 = vld [vmem:[%s2128_s3] sm:$0xff]  ;;  %v1781_v5 = vmov 0   ;;  %vm401_vm3 = vcmask 1043456   ;;  %vm397_vm4 = vcmask 31744   ;;  %v1487_v9 = vld [vmem:[%s2127_s2 + $0x8] sm:$0xff] }
  0x3a   : > { %1554 = vmatprep.mubr.msk.f32.mxu1 %vm1777_vm1, %v1775_v0  ;;  %1674 = vset.pattern.permute.xlu0 %v1781_v5  ;;  %v393_v6 = vld [vmem:[%s2127_s2] sm:$0xff]  ;;  %v1490_v11 = vld [vmem:[%s2127_s2 + $0x10] sm:$0xff]  ;;  %s1782_s29 = smov 4   ;;  %vm646_vm5 = vcmask 228384   ;;  %s1783_s22 = smov 126   ;;  %vm660_vm6 = vcmask 64512  }
  0x3b   : > { %1675 = vset.pattern.permute.xlu1 %v1781_v5  ;;  %v1993_v14 = vld [vmem:[%s2126_s1] ss:$0 sm:$0xff]  ;;  %s1784_s27 = smov 122   ;;  %v1495_v24 = vld [vmem:[%s2129_s4 + $0x8] sm:$0xff]  ;;  %v1497_v26 = vld [vmem:[%s2129_s4 + $0x10] sm:$0xff]  ;;  %s1785_s30 = smov 120  }
  0x3c   : > { %v648_v20 = vld [vmem:[%s2130_s5] sm:$0xff]  ;;  %v1500_v36 = vld [vmem:[%s2131_s6 + $0x8] sm:$0xff]  ;;  %v1502_v39 = vld [vmem:[%s2131_s6 + $0x10] sm:$0xff]  ;;  %s1484_s18 = sshll.u32 %s1947_s28, 3  ;;  %vm1391_vm7 = vcmask 195584   ;;  %p2145_p11 = scmp.ne.s32.totalorder %s2140_s25, 0 }
  0x3d   : > { %v655_v21 = vld [vmem:[%s2129_s4] sm:$0xff]  ;;  %v1505_v51 = vld [vmem:[%s2133_s8 + $0x8] sm:$0xff]  ;;  %v1507_v53 = vld [vmem:[%s2133_s8 + $0x10] sm:$0xff]  ;;  %s374_s12 = scalar_lea.vmem [#allocation7], %s1484_s18 }
  0x3e   : > { %v906_v34 = vld [vmem:[%s2131_s6] sm:$0xff] }
  0x3f   : > { %v899_v35 = vld [vmem:[%s2132_s7] sm:$0xff] }
  0x40   : > { %v1146_v47 = vld [vmem:[%s2134_s9] sm:$0xff] }
  0x41   : > { %v1153_v48 = vld [vmem:[%s2133_s8] sm:$0xff] }
  0xab   : > { %v382_v2 = vpop.permute.xlu0 %381 }
  0xac   : > { %385 = vst.msk [vmem:[#allocation2] sm:$0xf] %vm384_vm2, %v382_v2 }
  0xb3   : > { %v392_v3 = vld [vmem:[#allocation2] sm:$0xf] }
  0xb4   : > { %477 = vrot.lane.b32.xlu1 %v392_v3, %s1778_s24  ;;  %395 = vrot.lane.b32.xlu0 %v392_v3, %s1779_s20 }
  0xb8   : > { %557 = vrot.lane.b32.xlu1 %v392_v3, %s1780_s21  ;;  %389 = vperm.xlu0 %1674, %v386_v4  }
 0x126   : > { %v396_v7 = vpop.permute.xlu0 %395  ;;  %v478_v8 = vpop.permute.xlu1 %477 }
 0x127   : > { %1538 = vmatpush3.msk.msra.mxu0 %vm401_vm3, %v396_v7 }
 0x128   : > { %1540 = vmatmul.mubr.msk.f32.vlgmr.msra.gmra.mrb[0].mxu0 %vm397_vm4, %v393_v6  ;;  %1542 = vmatprep.subr.mxu0 %v1775_v0 }
 0x129   : > { %1543 = vmatpush3.msk.msra.mxu0 %vm401_vm3, %v478_v8  ;;  %1544 = vmatprep.mubr.msk.f32.mxu0 %vm1777_vm1, %v1775_v0 }
 0x12a   : > { %1547 = vmatprep.subr.mxu0 %v1775_v0  ;;  %v558_v10 = vpop.permute.xlu1 %557 }
 0x130   : > { %1545 = vmatmul.mubr.msk.f32.vlgmr.msra.gmra.mrb[0].mxu0 %vm397_vm4, %v1487_v9 }
 0x131   : > { %1548 = vmatpush3.msk.msra.mxu0 %vm401_vm3, %v558_v10  ;;  %1549 = vmatprep.mubr.msk.f32.mxu0 %vm1777_vm1, %v1775_v0 }
 0x132   : > { %1567 = vmatprep.subr.mxu0 %v1775_v0 }
 0x137   : > { %v390_v12 = vpop.permute.xlu0 %389 }
 0x138   : > { %1550 = vmatmul.mubr.msk.f32.vlgmr.msra.gmra.mrb[0].mxu0 %vm397_vm4, %v1490_v11 }
 0x139   : > { %1569 = vmatprep.mubr.msk.f32.mxu0 %vm1777_vm1, %v1775_v0 }
 0x20b   : > { %v630_v13 = vpop.f32.mrb[0].mxu0 }
 0x20c   : > { %v1597_v15 = vadd.f32 %v630_v13, %v390_v12  ;;  %v1551_v16 = vpop.f32.mrb[1].mxu0 }
 0x20e   : > { %v641_v17 = vmul.f32 %v1597_v15, %v1993_v14 }
 0x210   : > { %643 = vrot.lane.b32.xlu1 %v641_v17, %s1782_s29 }
 0x282   : > { %v644_v18 = vpop.permute.xlu1 %643 }
 0x283   : > { %647 = vst.msk [vmem:[#allocation3] sm:$0xff] %vm646_vm5, %v644_v18 }
 0x28a   : > { %v654_v19 = vld [vmem:[#allocation3] sm:$0xff] }
 0x28b   : > { %737 = vrot.lane.b32.xlu0 %v654_v19, %s1778_s24  ;;  %657 = vrot.lane.b32.xlu1 %v654_v19, %s1783_s22 }
 0x28f   : > { %651 = vperm.xlu0 %1674, %v648_v20   ;;  %816 = vrot.lane.b32.xlu1 %v654_v19, %s1784_s27  ;;  %s1510_s27 = sshll.u32 %s1863_s17, 7 }
 0x290   : > { %s2081_s11 = scalar_lea.hbm %s2135_s10, %s1510_s27 }
 0x2fd   : > { %v658_v22 = vpop.permute.xlu1 %657  ;;  %v738_v23 = vpop.permute.xlu0 %737 }
 0x2fe   : > { %1553 = vmatpush3.msra.mxu1 %v658_v22 }
 0x2ff   : > { %1555 = vmatmul.mubr.msk.f32.vlgmr.msra.gmra.mrb[0].mxu1 %vm660_vm6, %v655_v21  ;;  %1557 = vmatprep.subr.mxu1 %v1775_v0 }
 0x300   : > { %1558 = vmatpush3.msra.mxu1 %v738_v23  ;;  %1559 = vmatprep.mubr.msk.f32.mxu1 %vm1777_vm1, %v1775_v0 }
 0x301   : > { %1562 = vmatprep.subr.mxu1 %v1775_v0  ;;  %v817_v25 = vpop.permute.xlu1 %816 }
 0x307   : > { %1560 = vmatmul.mubr.msk.f32.vlgmr.msra.gmra.mrb[0].mxu1 %vm660_vm6, %v1495_v24 }
 0x308   : > { %1563 = vmatpush3.msra.mxu1 %v817_v25  ;;  %1564 = vmatprep.mubr.msk.f32.mxu1 %vm1777_vm1, %v1775_v0 }
 0x309   : > { %1582 = vmatprep.subr.mxu1 %v1775_v0 }
 0x30e   : > { %v652_v27 = vpop.permute.xlu0 %651 }
 0x30f   : > { %1565 = vmatmul.mubr.msk.f32.vlgmr.msra.gmra.mrb[0].mxu1 %vm660_vm6, %v1497_v26 }
 0x310   : > { %1584 = vmatprep.mubr.msk.f32.mxu1 %vm1777_vm1, %v1775_v0 }
 0x3e2   : > { %v888_v28 = vpop.f32.mrb[0].mxu1 }
 0x3e3   : > { %v1598_v29 = vadd.f32 %v888_v28, %v652_v27  ;;  %v1566_v30 = vpop.f32.mrb[1].mxu1 }
 0x3e5   : > { %v893_v31 = vmul.f32 %v1598_v29, %v1993_v14 }
 0x3e7   : > { %895 = vrot.lane.b32.xlu1 %v893_v31, %s1782_s29 }
 0x459   : > { %v896_v32 = vpop.permute.xlu1 %895 }
 0x45a   : > { %898 = vst.msk [vmem:[#allocation2] sm:$0xff] %vm646_vm5, %v896_v32 }
 0x461   : > { %v905_v33 = vld [vmem:[#allocation2] sm:$0xff] }
 0x462   : > { %1063 = vrot.lane.b32.xlu1 %v905_v33, %s1785_s30  ;;  %984 = vrot.lane.b32.xlu0 %v905_v33, %s1778_s24  ;;  %s1407_s30 = sshll.u32 %s374_s12, 4  ;;  %s2083_s30 = int_to_ptr.vmem [resolvable:$true] %s1407_s30 }
 0x463   : > { %1568 = vmatpush3.msra.mxu0 %v905_v33  ;;  %s1706_s17 = scalar_lea.vmem %s2083_s30, 128 }
 0x464   : > { %1570 = vmatmul.mubr.msk.f32.vlgmr.msra.gmra.mrb[2].mxu0 %vm660_vm6, %v906_v34  ;;  %1572 = vmatprep.subr.mxu0 %v1775_v0  ;;  %p1707_p6 = scmp.ne.s32.totalorder %s2083_s30, %s1706_s17 }
 0x465   : > { %1574 = vmatprep.mubr.msk.f32.mxu0 %vm1777_vm1, %v1775_v0 }
 0x466   : > { %902 = vperm.xlu0 %1674, %v899_v35   ;;  %p1708_p12 = pnand %p1707_p6, %p2145_p11 }
 0x468   : > { %p1709_p13 = pneg %p1708_p12 }
 0x4d4   : > { %v985_v37 = vpop.permute.xlu0 %984  ;;  %v1064_v38 = vpop.permute.xlu1 %1063 }
 0x4d5   : > { %1573 = vmatpush3.msra.mxu0 %v985_v37 }
 0x4d6   : > { %1575 = vmatmul.mubr.msk.f32.vlgmr.msra.gmra.mrb[2].mxu0 %vm660_vm6, %v1500_v36  ;;  %1577 = vmatprep.subr.mxu0 %v1775_v0 }
 0x4d7   : > { %1578 = vmatpush3.msra.mxu0 %v1064_v38  ;;  %1579 = vmatprep.mubr.msk.f32.mxu0 %vm1777_vm1, %v1775_v0 }
 0x4de   : > { %1580 = vmatmul.mubr.msk.f32.vlgmr.msra.gmra.mrb[2].mxu0 %vm660_vm6, %v1502_v39 }
 0x4e5   : > { %v903_v40 = vpop.permute.xlu0 %902 }
 0x5b1   : > { %v1135_v41 = vpop.f32.mrb[2].mxu0 }
 0x5b2   : > { %v1599_v42 = vadd.f32 %v1135_v41, %v903_v40  ;;  %v1581_v43 = vpop.f32.mrb[3].mxu0 }
 0x5b4   : > { %v1140_v44 = vmul.f32 %v1599_v42, %v1993_v14 }
 0x5b6   : > { %1142 = vrot.lane.b32.xlu1 %v1140_v44, %s1782_s29 }
 0x628   : > { %v1143_v45 = vpop.permute.xlu1 %1142 }
 0x629   : > { %1145 = vst.msk [vmem:[#allocation3] sm:$0xff] %vm646_vm5, %v1143_v45 }
 0x630   : > { %v1152_v46 = vld [vmem:[#allocation3] sm:$0xff] }
 0x631   : > { %1234 = vrot.lane.b32.xlu1 %v1152_v46, %s1778_s24  ;;  %1155 = vrot.lane.b32.xlu0 %v1152_v46, %s1779_s20  ;;  %s1394_s24 = scalar_lea.sflag [#allocation6], %s1947_s28  ;;  %s1786_s20 = smov [#allocation7]  }
 0x635   : > { %1313 = vrot.lane.b32.xlu0 %v1152_v46, %s1780_s21  ;;  %1149 = vperm.xlu1 %1675, %v1146_v47   ;;  %s1710_s21 = sshll.u32 %s1786_s20, 4  ;;  %s1711_s21 = int_to_ptr.vmem [resolvable:$false] %s1710_s21 }
 0x636   : > { %s1712_s29 = scalar_lea.vmem %s1711_s21, 256  ;;  %p1713_p7 = scmp.lt.s32.totalorder %s2083_s30, %s1711_s21 }
 0x637   : > { %p1714_p10 = scmp.lt.s32.totalorder %s1712_s29, %s1706_s17 }
 0x639   : > { %p1715_p2 = por %p1714_p10, %p1713_p7 }
 0x63b   : > { %p1716_p4 = pnand %p1715_p2, %p1709_p13 }
 0x6a3   : > { %v1156_v49 = vpop.permute.xlu0 %1155  ;;  %v1235_v50 = vpop.permute.xlu1 %1234 }
 0x6a4   : > { %1583 = vmatpush3.msra.mxu1 %v1156_v49 }
 0x6a5   : > { %1585 = vmatmul.mubr.msk.f32.vlgmr.msra.gmra.mrb[2].mxu1 %vm660_vm6, %v1153_v48  ;;  %1587 = vmatprep.subr.mxu1 %v1775_v0 }
 0x6a6   : > { %1588 = vmatpush3.msra.mxu1 %v1235_v50  ;;  %1589 = vmatprep.mubr.msk.f32.mxu1 %vm1777_vm1, %v1775_v0 }
 0x6a7   : > { %1592 = vmatprep.subr.mxu1 %v1775_v0  ;;  %v1314_v52 = vpop.permute.xlu0 %1313 }
 0x6ad   : > { %1590 = vmatmul.mubr.msk.f32.vlgmr.msra.gmra.mrb[2].mxu1 %vm660_vm6, %v1505_v51 }
 0x6ae   : > { %1593 = vmatpush3.msra.mxu1 %v1314_v52  ;;  %1594 = vmatprep.mubr.msk.f32.mxu1 %vm1777_vm1, %v1775_v0 }
 0x6b4   : > { %v1150_v54 = vpop.permute.xlu1 %1149 }
 0x6b5   : > { %1595 = vmatmul.mubr.msk.f32.vlgmr.msra.gmra.mrb[2].mxu1 %vm660_vm6, %v1507_v53 }
 0x788   : > { %v1385_v55 = vpop.f32.mrb[2].mxu1 }
 0x789   : > { %v1600_v56 = vadd.f32 %v1385_v55, %v1150_v54  ;;  %v1596_v57 = vpop.f32.mrb[3].mxu1 }
 0x78b   : > { %v1390_v58 = vmul.f32 %v1600_v56, %v1993_v14 }
 0x78d   : > { %1392 = vst.msk [vmem:[%s374_s12] sm:$0xff] %vm1391_vm7, %v1390_v58 }
 0x78e   : > { %1719 = shalt.err (!%p1716_p4)
}
 0x78f   : > { %s1720_s28 = scalar_lea.hbm %s2081_s11, 128  ;;  %s1724_s12 = scalar_lea.hbm %s2135_s10, 256 }
 0x790   : > { %p1721_p5 = scmp.ne.s32.totalorder %s2081_s11, %s1720_s28  ;;  %p1725_p0 = scmp.lt.u32.totalorder %s2081_s11, %s2135_s10 }
 0x791   : > { %p1726_p1 = scmp.lt.u32.totalorder %s1724_s12, %s1720_s28  ;;  %p1728_p6 = scmp.lt.u32.totalorder %s1720_s28, %s2081_s11 }
 0x792   : > { %p1722_p8 = pnand %p1721_p5, %p2145_p11 }
 0x793   : > { %p1727_p3 = por %p1726_p1, %p1725_p0 }
 0x794   : > { %p1723_p9 = pneg %p1722_p8 }
 0x795   : > { %p1729_p12 = por %p1728_p6, %p1727_p3 }
 0x797   : > { %p1730_p13 = pnand %p1729_p12, %p1723_p9 }
 0x799   : > { %1733 = shalt.err (!%p1730_p13)
}
 0x79a   : > { %1619 = dma.vmem_to_hbm [thread:$0]  (%p2145_p11), %s2083_s30, 128, %s2081_s11, %s1394_s24  }
 0x79b PF: > { %s1419_s17 = sand.u32 1, %s1760_s13   ;;  %p2146_p7 = scmp.ne.s32.totalorder %s2141_s26, 0 }
 0x79c   : > { %p2147_p10 = scmp.ge.s32.totalorder %s1772_s16, 2  ;;  %s1420_s20 = scalar_lea.sflag [#allocation6], %s1419_s17 }
 0x79e   : > { %p1626_p2 = pnand %p2147_p10, %p2146_p7 }
 0x7a0   : > { %1755 = dma.done.wait (!%p1626_p2), %s1420_s20, 128  }
 0x7a1   : > { %1757 = vsyncadd (!%p1626_p2), %s1420_s20, 4294967168  ;;  %s2148_s21 = sld [smem:[#allocation10_spill]]  ;;  %p23_p4 = scmp.ge.s32.totalorder %s1867_s19, 4  }
 0x7a2   : > { %s2149_s13 = smov %s1764_s14  ;;  %s2150_s14 = smov %s1768_s15 }
 0x7a3   : > { %s2152_s16 = smov %s1867_s19  ;;  %25 = sbr.rel (!%p23_p4) target bundleno = 5 (0x5), region = 113 }
 0x7a7   : > { %s2151_s15 = smov %s2148_s21 }
 0x7aa   :  { %1425 = vsyncpa [#allocation5], 1 }
 0x7ab   :  { %1427 = vsyncpa [#allocation5 + $0x1], 1 }
 0x7ac   :  { %1428 = vsyncpa [#allocation6], 1 }
 0x7ad   :  { %1430 = vsyncpa [#allocation6 + $0x1], 1 }

</bundles_post_ra>
